<compile_context>
chip_gen: v6e
topology: v6e:2x2x1
jax: 0.10.0
libtpu: 0.0.40
codegen_flags: <defaults>
</compile_context>

<pallas_src>
import functools

import jax
import jax.numpy as jnp
from jax.experimental import pallas as pl
from jax.experimental.pallas import tpu as pltpu


def _round_up(x: int, m: int) -> int:
    return ((x + m - 1) // m) * m


def _largest_tile(total: int, base: int, cap: int) -> int:
    """Largest multiple of `base` that divides `total` and is <= cap.

    `total` is assumed to already be a multiple of `base`, so `base` is always
    a valid fallback.
    """
    cap = min(cap, total)
    cap = (cap // base) * base
    for t in range(cap, base - 1, -base):
        if total % t == 0:
            return t
    return base


def _interval_linear_kernel_single(xl_ref, xu_ref, w_ref, b_ref, lo_ref, up_ref,
                                   *, use_bf16=False):
    """Whole-K-stripe path: no reduction grid axis, no accumulators."""
    xl = xl_ref[...]
    xu = xu_ref[...]
    # Midpoint / radius (VPU work, hidden under the MXU).
    c = (xl + xu) * 0.5
    r = (xu - xl) * 0.5
    w = w_ref[...]
    w_abs = jnp.abs(w)
    if use_bf16:
        c = c.astype(jnp.bfloat16)
        r = r.astype(jnp.bfloat16)
        w = w.astype(jnp.bfloat16)
        w_abs = w_abs.astype(jnp.bfloat16)
    center = jnp.dot(c, w, preferred_element_type=jnp.float32) + b_ref[...]
    radius = jnp.dot(r, w_abs, preferred_element_type=jnp.float32)
    lo_ref[...] = center - radius
    up_ref[...] = center + radius


def _interval_linear_kernel_kacc(xl_ref, xu_ref, w_ref, b_ref, lo_ref, up_ref,
                                 *, use_bf16=False):
    """K-tiled path: accumulate directly into the f32 output tiles (resident
    across the K axis because their index_map ignores k)."""
    k = pl.program_id(2)

    @pl.when(k == 0)
    def _():
        bias = b_ref[...]                                   # (1, tn)
        lo_ref[...] = jnp.broadcast_to(bias, lo_ref.shape)
        up_ref[...] = jnp.broadcast_to(bias, up_ref.shape)

    xl = xl_ref[...]
    xu = xu_ref[...]
    c = (xl + xu) * 0.5
    r = (xu - xl) * 0.5
    w = w_ref[...]
    w_abs = jnp.abs(w)
    if use_bf16:
        c = c.astype(jnp.bfloat16)
        r = r.astype(jnp.bfloat16)
        w = w.astype(jnp.bfloat16)
        w_abs = w_abs.astype(jnp.bfloat16)
    dc = jnp.dot(c, w, preferred_element_type=jnp.float32)
    dr = jnp.dot(r, w_abs, preferred_element_type=jnp.float32)
    lo_ref[...] += dc - dr
    up_ref[...] += dc + dr


def _pad2(a, rows, cols):
    pr, pc = rows - a.shape[0], cols - a.shape[1]
    if pr == 0 and pc == 0:
        return a                                            # skip the HBM copy
    return jnp.pad(a, ((0, pr), (0, pc)))


def interval_linear(x_lower, x_upper, W, b, *, use_bf16_matmul=False):
    """Interval-arithmetic linear layer.

    x_lower, x_upper: (batch, in_features)
    W:                (in_features, out_features)  (already transposed, like layer.weight.t())
    b:                (out_features,)
    Returns (lower, upper), each (batch, out_features) in x_lower.dtype.
    """
    batch, in_f = x_lower.shape
    assert W.shape[0] == in_f
    out_f = W.shape[1]
    out_dtype = x_lower.dtype

    # --- pad only to (8,128) alignment --------------------------------------------
    M_pad = _round_up(batch, 8)
    K_pad = _round_up(in_f, 128)
    N_pad = _round_up(out_f, 128)

    # --- divisor-aware tile selection ----------------------------------------------
    tm = _largest_tile(M_pad, 8, 256)
    tn = _largest_tile(N_pad, 128, 512)
    single_pass = K_pad <= 2048          # whole K stripe fits comfortably in VMEM
    tk = K_pad if single_pass else _largest_tile(K_pad, 128, 1024)

    # v7x megacore: make sure the two parallel axes expose >= 2 blocks when possible.
    if (M_pad // tm == 1) and (N_pad // tn == 1) and N_pad >= 256:
        tn = _largest_tile(N_pad, 128, N_pad // 2)

    # --- pad arrays (no-op copies are skipped) --------------------------------------
    xl_p = _pad2(x_lower, M_pad, K_pad)
    xu_p = _pad2(x_upper, M_pad, K_pad)
    W_p = _pad2(W, K_pad, N_pad)
    b2 = b.reshape(1, -1)
    b_p = b2 if out_f == N_pad else jnp.pad(b2, ((0, 0), (0, N_pad - out_f)))

    # --- VMEM budget: actual footprint (double-buffered) + margin, capped for v7x ---
    bpe = 4
    inputs_bytes = 2 * (2 * tm * tk + tk * tn + tn) * bpe    # xl, xu, W, b
    outputs_bytes = 2 * 2 * tm * tn * bpe                    # lo, up (f32)
    temps_bytes = (2 * tm * tk + tk * tn) * bpe              # c, r, |W|
    vmem_limit = min(
        int(1.5 * (inputs_bytes + outputs_bytes + temps_bytes)) + (4 << 20),
        48 << 20,
    )

    out_shape = (
        jax.ShapeDtypeStruct((M_pad, N_pad), jnp.float32),
        jax.ShapeDtypeStruct((M_pad, N_pad), jnp.float32),
    )

    if single_pass:
        grid = (M_pad // tm, N_pad // tn)
        kernel = functools.partial(_interval_linear_kernel_single,
                                   use_bf16=use_bf16_matmul)
        grid_spec = pltpu.PrefetchScalarGridSpec(
            num_scalar_prefetch=0,
            grid=grid,
            in_specs=[
                pl.BlockSpec((tm, K_pad), lambda i, j: (i, 0)),   # x_lower
                pl.BlockSpec((tm, K_pad), lambda i, j: (i, 0)),   # x_upper
                pl.BlockSpec((K_pad, tn), lambda i, j: (0, j)),   # W
                pl.BlockSpec((1, tn), lambda i, j: (0, j)),       # bias
            ],
            out_specs=(
                pl.BlockSpec((tm, tn), lambda i, j: (i, j)),      # lower
                pl.BlockSpec((tm, tn), lambda i, j: (i, j)),      # upper
            ),
        )
        dim_sem = ("parallel", "parallel")
    else:
        grid = (M_pad // tm, N_pad // tn, K_pad // tk)
        kernel = functools.partial(_interval_linear_kernel_kacc,
                                   use_bf16=use_bf16_matmul)
        grid_spec = pltpu.PrefetchScalarGridSpec(
            num_scalar_prefetch=0,
            grid=grid,
            in_specs=[
                pl.BlockSpec((tm, tk), lambda i, j, k: (i, k)),   # x_lower
                pl.BlockSpec((tm, tk), lambda i, j, k: (i, k)),   # x_upper
                pl.BlockSpec((tk, tn), lambda i, j, k: (k, j)),   # W
                pl.BlockSpec((1, tn), lambda i, j, k: (0, j)),    # bias
            ],
            out_specs=(
                pl.BlockSpec((tm, tn), lambda i, j, k: (i, j)),   # lower (K-resident)
                pl.BlockSpec((tm, tn), lambda i, j, k: (i, j)),   # upper (K-resident)
            ),
        )
        dim_sem = ("parallel", "parallel", "arbitrary")

    lo, up = pl.pallas_call(
        kernel,
        out_shape=out_shape,
        grid_spec=grid_spec,
        compiler_params=pltpu.CompilerParams(
            dimension_semantics=dim_sem,
            vmem_limit_bytes=vmem_limit,
        ),
    )(xl_p, xu_p, W_p, b_p)

    lo = lo[:batch, :out_f].astype(out_dtype)
    up = up[:batch, :out_f].astype(out_dtype)
    return lo, up


def _reference(x_lower, x_upper, W, b):
    # Same math as the PyTorch forward (clamp-split form).
    W_pos = jnp.maximum(W, 0.0)
    W_neg = jnp.minimum(W, 0.0)
    lo = x_lower @ W_pos + x_upper @ W_neg + b
    up = x_upper @ W_pos + x_lower @ W_neg + b
    return lo, up


if __name__ == "__main__":
    key = jax.random.PRNGKey(0)

    # --- test 1: small linear layer (single-pass kernel path) ----------------------
    k_xl, k_eps, k_w, k_b = jax.random.split(key, 4)
    batch, in_features, out_features = 8, 32, 32
    W = jax.random.normal(k_w, (in_features, out_features), dtype=jnp.float32) * 0.1
    b = jax.random.normal(k_b, (out_features,), dtype=jnp.float32) * 0.1
    center = jax.random.normal(k_xl, (batch, in_features), dtype=jnp.float32)
    radius = jnp.abs(jax.random.normal(k_eps, (batch, in_features), dtype=jnp.float32)) * 0.05
    x_lower = center - radius
    x_upper = center + radius

    lo, up = interval_linear(x_lower, x_upper, W, b)
    jax.block_until_ready((lo, up))
    ref_lo, ref_up = _reference(x_lower, x_upper, W, b)
    assert lo.shape == (batch, out_features) and up.shape == (batch, out_features)
    assert jnp.allclose(lo, ref_lo, atol=1e-4), "lower mismatch (single-pass)"
    assert jnp.allclose(up, ref_up, atol=1e-4), "upper mismatch (single-pass)"
    assert bool(jnp.all(lo <= up + 1e-6)), "interval ordering violated (single-pass)"

    # --- test 2: wide K, already (8,128)-aligned (K-tiled accumulate path, no padding copy)
    k_xl2, k_eps2, k_w2, k_b2 = jax.random.split(jax.random.PRNGKey(1), 4)
    batch2, in2, out2 = 8, 2304, 256      # K_pad = 2304 > 2048 -> multi-K path, tk=768
    W2 = jax.random.normal(k_w2, (in2, out2), dtype=jnp.float32) * 0.02
    b2 = jax.random.normal(k_b2, (out2,), dtype=jnp.float32) * 0.1
    c2 = jax.random.normal(k_xl2, (batch2, in2), dtype=jnp.float32)
    r2 = jnp.abs(jax.random.normal(k_eps2, (batch2, in2), dtype=jnp.float32)) * 0.05
    xl2, xu2 = c2 - r2, c2 + r2

    lo2, up2 = interval_linear(xl2, xu2, W2, b2)
    jax.block_until_ready((lo2, up2))
    ref_lo2, ref_up2 = _reference(xl2, xu2, W2, b2)
    assert jnp.allclose(lo2, ref_lo2, atol=5e-3), "lower mismatch (K-tiled)"
    assert jnp.allclose(up2, ref_up2, atol=5e-3), "upper mismatch (K-tiled)"
    assert bool(jnp.all(lo2 <= up2 + 1e-5)), "interval ordering violated (K-tiled)"

    print("KERNEL_OK")
</pallas_src>

<mosaic_0001>
module attributes {stable_mosaic.version = 11 : i64} {
  func.func @_interval_linear_kernel_single(%arg0: i32, %arg1: i32, %arg2: memref<8x128xf32, #tpu.memory_space<vmem>>, %arg3: memref<8x128xf32, #tpu.memory_space<vmem>>, %arg4: memref<128x128xf32, #tpu.memory_space<vmem>>, %arg5: memref<1x128xf32, #tpu.memory_space<vmem>>, %arg6: memref<8x128xf32, #tpu.memory_space<vmem>>, %arg7: memref<8x128xf32, #tpu.memory_space<vmem>>) attributes {dimension_semantics = [#tpu.dimension_semantics<parallel>, #tpu.dimension_semantics<parallel>], iteration_bounds = array<i64: 1, 1>, scalar_prefetch = 0 : i64, scratch_operands = 0 : i64, tpu.core_type = #tpu.core_type<tc>, window_params = [{transform_indices = @transform_0, window_bounds = array<i64: 8, 128>}, {transform_indices = @transform_1, window_bounds = array<i64: 8, 128>}, {transform_indices = @transform_2, window_bounds = array<i64: 128, 128>}, {transform_indices = @transform_3, window_bounds = array<i64: 1, 128>}, {transform_indices = @transform_4, window_bounds = array<i64: 8, 128>}, {transform_indices = @transform_5, window_bounds = array<i64: 8, 128>}]} {
    %c0 = arith.constant 0 : index
    %c0_0 = arith.constant 0 : index
    %0 = vector.load %arg2[%c0, %c0_0] : memref<8x128xf32, #tpu.memory_space<vmem>>, vector<8x128xf32>
    %c0_1 = arith.constant 0 : index
    %c0_2 = arith.constant 0 : index
    %1 = vector.load %arg3[%c0_1, %c0_2] : memref<8x128xf32, #tpu.memory_space<vmem>>, vector<8x128xf32>
    %2 = arith.addf %0, %1 : vector<8x128xf32>
    %cst = arith.constant 5.000000e-01 : f32
    %3 = vector.broadcast %cst : f32 to vector<8x128xf32>
    %4 = arith.mulf %2, %3 : vector<8x128xf32>
    %5 = arith.subf %1, %0 : vector<8x128xf32>
    %cst_3 = arith.constant 5.000000e-01 : f32
    %6 = vector.broadcast %cst_3 : f32 to vector<8x128xf32>
    %7 = arith.mulf %5, %6 : vector<8x128xf32>
    %c0_4 = arith.constant 0 : index
    %c0_5 = arith.constant 0 : index
    %8 = vector.load %arg4[%c0_4, %c0_5] : memref<128x128xf32, #tpu.memory_space<vmem>>, vector<128x128xf32>
    %9 = math.absf %8 : vector<128x128xf32>
    %cst_6 = arith.constant dense<0.000000e+00> : vector<8x128xf32>
    %10 = tpu.matmul %4, %8, %cst_6 {dimension_numbers = #tpu.dot_dimension_numbers<[1], [0], [0], [1], [0, 0, 1, 1], [], []>} : vector<8x128xf32>, vector<128x128xf32>, vector<8x128xf32> -> vector<8x128xf32>
    %c0_7 = arith.constant 0 : index
    %c0_8 = arith.constant 0 : index
    %11 = vector.load %arg5[%c0_7, %c0_8] : memref<1x128xf32, #tpu.memory_space<vmem>>, vector<1x128xf32>
    %12 = vector.broadcast %11 : vector<1x128xf32> to vector<8x128xf32>
    %13 = arith.addf %10, %12 : vector<8x128xf32>
    %cst_9 = arith.constant dense<0.000000e+00> : vector<8x128xf32>
    %14 = tpu.matmul %7, %9, %cst_9 {dimension_numbers = #tpu.dot_dimension_numbers<[1], [0], [0], [1], [0, 0, 1, 1], [], []>} : vector<8x128xf32>, vector<128x128xf32>, vector<8x128xf32> -> vector<8x128xf32>
    %15 = arith.subf %13, %14 : vector<8x128xf32>
    %c0_10 = arith.constant 0 : index
    %c0_11 = arith.constant 0 : index
    %16 = vector.load %arg6[%c0_10, %c0_11] : memref<8x128xf32, #tpu.memory_space<vmem>>, vector<8x128xf32>
    tpu.vector_store %arg6[%c0_10, %c0_11], %15 {strides = array<i32>} : memref<8x128xf32, #tpu.memory_space<vmem>>, vector<8x128xf32>,
    %17 = arith.addf %13, %14 : vector<8x128xf32>
    %c0_12 = arith.constant 0 : index
    %c0_13 = arith.constant 0 : index
    %18 = vector.load %arg7[%c0_12, %c0_13] : memref<8x128xf32, #tpu.memory_space<vmem>>, vector<8x128xf32>
    tpu.vector_store %arg7[%c0_12, %c0_13], %17 {strides = array<i32>} : memref<8x128xf32, #tpu.memory_space<vmem>>, vector<8x128xf32>,
    return
  }
  func.func @transform_0(%arg0: i32, %arg1: i32) -> (i32, i32) {
    %c0_i32 = arith.constant 0 : i32
    %c0_i32_0 = arith.constant 0 : i32
    return %arg0, %c0_i32 : i32, i32
  }
  func.func @transform_1(%arg0: i32, %arg1: i32) -> (i32, i32) {
    %c0_i32 = arith.constant 0 : i32
    %c0_i32_0 = arith.constant 0 : i32
    return %arg0, %c0_i32 : i32, i32
  }
  func.func @transform_2(%arg0: i32, %arg1: i32) -> (i32, i32) {
    %c0_i32 = arith.constant 0 : i32
    %c0_i32_0 = arith.constant 0 : i32
    return %c0_i32, %arg1 : i32, i32
  }
  func.func @transform_3(%arg0: i32, %arg1: i32) -> (i32, i32) {
    %c0_i32 = arith.constant 0 : i32
    %c0_i32_0 = arith.constant 0 : i32
    return %c0_i32, %arg1 : i32, i32
  }
  func.func @transform_4(%arg0: i32, %arg1: i32) -> (i32, i32) {
    %c0_i32 = arith.constant 0 : i32
    return %arg0, %arg1 : i32, i32
  }
  func.func @transform_5(%arg0: i32, %arg1: i32) -> (i32, i32) {
    %c0_i32 = arith.constant 0 : i32
    return %arg0, %arg1 : i32, i32
  }
}

</mosaic_0001>

<bundles_post_ra>
// kernel: tpu_custom_call.1
= control target key start
LH: loop header
LB: loop body
LE: loop exit
PB: predicated region body
PF: predicated region fallthrough
CT: control target
= control target key end

     0   :  { %11 = vsyncpa [#allocation3], 0  ;;  %s590_s0 = inlined_call_operand.hbm [shape: f32[8,128], index: 0, kind: input, shape index: {}]   ;;  %s591_s1 = inlined_call_operand.hbm [shape: f32[8,128], index: 1, kind: input, shape index: {}]   ;;  %s592_s2 = inlined_call_operand.hbm [shape: f32[128,128], index: 2, kind: input, shape index: {}]   ;;  %s593_s3 = inlined_call_operand.vmem [shape: f32[1,128], index: 3, kind: input, shape index: {}]   ;;  %s594_s4 = inlined_call_operand.hbm [shape: f32[8,128], index: 4, kind: output, shape index: {0}]   ;;  %s595_s5 = inlined_call_operand.hbm [shape: f32[8,128], index: 5, kind: output, shape index: {1}]  }
   0x1   :  { %12 = vsyncpa [#allocation6], 0 }
   0x2   :  { %13 = vsyncpa [#allocation4], 0 }
   0x3   :  { %14 = vsyncpa [#allocation10], 0  ;;  %s499_s18 = smov [#allocation5]   ;;  %s500_s20 = smov [#allocation2]  }
   0x4   :  { %s31_s19 = sshll.u32 %s499_s18, 4  ;;  %s21_s21 = sshll.u32 %s500_s20, 4  ;;  %s32_s19 = int_to_ptr.vmem [resolvable:$true] %s31_s19  ;;  %s22_s21 = int_to_ptr.vmem [resolvable:$true] %s21_s21 }
   0x5   :  { %s399_s22 = scalar_lea.vmem %s32_s19, 128  ;;  %p404_p1 = scmp.lt.s32.totalorder %s32_s19, %s32_s19 }
   0x6   :  { %p400_p0 = scmp.ne.s32.totalorder %s32_s19, %s399_s22  ;;  %p405_p2 = scmp.lt.s32.totalorder %s399_s22, %s399_s22 }
   0x8   :  { %p406_p3 = por %p405_p2, %p404_p1 }
   0xa   :  { %p407_p4 = pnand %p406_p3, %p400_p0 }
   0xc   :  { %410 = shalt.err (!%p407_p4)
}
   0xd   :  { %34 = dma.hbm_to_vmem [thread:$0]  %s591_s1, 128, %s32_s19, [#allocation6]  }
   0xe   :  { %s419_s25 = scalar_lea.vmem %s22_s21, 128  ;;  %p424_p6 = scmp.lt.s32.totalorder %s22_s21, %s22_s21 }
   0xf   :  { %p420_p5 = scmp.ne.s32.totalorder %s22_s21, %s419_s25  ;;  %p425_p7 = scmp.lt.s32.totalorder %s419_s25, %s419_s25 }
  0x11   :  { %p426_p8 = por %p425_p7, %p424_p6 }
  0x13   :  { %p427_p9 = pnand %p426_p8, %p420_p5 }
  0x15   :  { %430 = shalt.err (!%p427_p9)
}
  0x16   :  { %24 = dma.hbm_to_vmem [thread:$0]  %s590_s0, 128, %s22_s21, [#allocation3]  }
  0x17   :  { %s501_s28 = smov [#allocation7]  }
  0x18   :  { %s40_s29 = sshll.u32 %s501_s28, 4  ;;  %s41_s29 = int_to_ptr.vmem [resolvable:$true] %s40_s29 }
  0x19   :  { %s439_s30 = scalar_lea.vmem %s41_s29, 2048  ;;  %p444_p11 = scmp.lt.s32.totalorder %s41_s29, %s41_s29 }
  0x1a   :  { %p440_p10 = scmp.ne.s32.totalorder %s41_s29, %s439_s30  ;;  %p445_p12 = scmp.lt.s32.totalorder %s439_s30, %s439_s30 }
  0x1c   :  { %p446_p13 = por %p445_p12, %p444_p11 }
  0x1e   :  { %p447_p0 = pnand %p446_p13, %p440_p10 }
  0x20   :  { %450 = shalt.err (!%p447_p0)
}
  0x21   :  { %s502_s1 = smov 128   ;;  %s503_s6 = smov 8  }
  0x22   :  { %46 = dma.hbm_to_vmem [thread:$0]  %s592_s2, 2048, %s41_s29, [#allocation6], %s502_s1, %s502_s1, %s503_s6  }
  0x23   :  { %491 = dma.done.wait [#allocation3], 128  }
  0x24   :  { %492 = vsyncadd [#allocation3], 4294967168 }
  0x25   :  { %493 = dma.done.wait [#allocation6], 2176  }
  0x26   :  { %494 = vsyncadd [#allocation6], 4294965120  ;;  %v504_v0 = vmov 0.0   ;;  %vm505_vm0 = vmmov 0   ;;  %v79_v1 = vld [vmem:[#allocation7 + $0x78] sm:$0xff]  ;;  %v78_v2 = vld [vmem:[#allocation7 + $0x70] sm:$0xff] }
  0x27   :  { %312 = vmatprep.subr.mxu0 %v504_v0  ;;  %347 = vmatprep.subr.mxu1 %v504_v0  ;;  %v77_v3 = vld [vmem:[#allocation7 + $0x68] sm:$0xff]  ;;  %v94_v4 = vand.u32 2147483647, %v78_v2  ;;  %v95_v5 = vand.u32 2147483647, %v79_v1  ;;  %v76_v6 = vld [vmem:[#allocation7 + $0x60] sm:$0xff] }
  0x28   :  { %344 = vmatprep.mubr.msk.f32.mxu0 %vm505_vm0, %v504_v0  ;;  %379 = vmatprep.mubr.msk.f32.mxu1 %vm505_vm0, %v504_v0  ;;  %v93_v7 = vand.u32 2147483647, %v77_v3  ;;  %v75_v8 = vld [vmem:[#allocation7 + $0x58] sm:$0xff]  ;;  %v92_v9 = vand.u32 2147483647, %v76_v6  ;;  %v74_v10 = vld [vmem:[#allocation7 + $0x50] sm:$0xff] }
  0x29   :  { %313 = vmatpush3.msra.mxu0 %v79_v1  ;;  %348 = vmatpush3.msra.mxu1 %v95_v5  ;;  %v91_v11 = vand.u32 2147483647, %v75_v8  ;;  %v73_v12 = vld [vmem:[#allocation7 + $0x48] sm:$0xff]  ;;  %v90_v13 = vand.u32 2147483647, %v74_v10  ;;  %v72_v14 = vld [vmem:[#allocation7 + $0x40] sm:$0xff] }
  0x2a   :  { %314 = vmatprep.subr.mxu0 %v504_v0  ;;  %349 = vmatprep.subr.mxu1 %v504_v0  ;;  %v89_v15 = vand.u32 2147483647, %v73_v12  ;;  %v71_v16 = vld [vmem:[#allocation7 + $0x38] sm:$0xff]  ;;  %v88_v17 = vand.u32 2147483647, %v72_v14  ;;  %v70_v18 = vld [vmem:[#allocation7 + $0x30] sm:$0xff] }
  0x2b   :  { %315 = vmatpush3.msra.mxu0 %v78_v2  ;;  %350 = vmatpush3.msra.mxu1 %v94_v4  ;;  %v87_v19 = vand.u32 2147483647, %v71_v16  ;;  %v69_v20 = vld [vmem:[#allocation7 + $0x28] sm:$0xff]  ;;  %v86_v21 = vand.u32 2147483647, %v70_v18  ;;  %v68_v22 = vld [vmem:[#allocation7 + $0x20] sm:$0xff] }
  0x2c   :  { %316 = vmatprep.subr.mxu0 %v504_v0  ;;  %351 = vmatprep.subr.mxu1 %v504_v0  ;;  %v85_v23 = vand.u32 2147483647, %v69_v20  ;;  %v67_v24 = vld [vmem:[#allocation7 + $0x18] sm:$0xff]  ;;  %v84_v25 = vand.u32 2147483647, %v68_v22  ;;  %v58_v26 = vld [vmem:[#allocation2] sm:$0xff] }
  0x2d   :  { %317 = vmatpush3.msra.mxu0 %v77_v3  ;;  %352 = vmatpush3.msra.mxu1 %v93_v7  ;;  %v59_v27 = vld [vmem:[#allocation5] sm:$0xff]  ;;  %v66_v28 = vld [vmem:[#allocation7 + $0x10] sm:$0xff]  ;;  %v83_v29 = vand.u32 2147483647, %v67_v24  ;;  %v65_v30 = vld [vmem:[#allocation7 + $0x8] sm:$0xff]  ;;  %s506_s9 = smov [#allocation8]  }
  0x2e   :  { %318 = vmatprep.subr.mxu0 %v504_v0  ;;  %353 = vmatprep.subr.mxu1 %v504_v0  ;;  %v60_v31 = vadd.f32 %v59_v27, %v58_v26  ;;  %v82_v32 = vand.u32 2147483647, %v66_v28  ;;  %v64_v33 = vld [vmem:[#allocation7] sm:$0xff]  ;;  %v62_v34 = vsub.f32 %v59_v27, %v58_v26  ;;  %v81_v35 = vand.u32 2147483647, %v65_v30  ;;  %s253_s10 = sshll.u32 %s506_s9, 4  ;;  %s254_s10 = int_to_ptr.vmem [resolvable:$true] %s253_s10 }
  0x2f   :  { %319 = vmatpush3.msra.mxu0 %v76_v6  ;;  %354 = vmatpush3.msra.mxu1 %v92_v9  ;;  %v80_v37 = vand.u32 2147483647, %v64_v33  ;;  %v277_v39 = vld [vmem:[%s593_s3] ss:$0 sm:$0xff]  ;;  %s507_s11 = smov [#allocation9]   ;;  %s451_s13 = scalar_lea.vmem %s254_s10, 128 }
  0x30   :  { %320 = vmatprep.subr.mxu0 %v504_v0  ;;  %355 = vmatprep.subr.mxu1 %v504_v0  ;;  %v61_v36 = vmul.f32 0.5, %v60_v31  ;;  %v63_v38 = vmul.f32 0.5, %v62_v34  ;;  %s263_s12 = sshll.u32 %s507_s11, 4  ;;  %p452_p1 = scmp.ne.s32.totalorder %s254_s10, %s451_s13  ;;  %s264_s12 = int_to_ptr.vmem [resolvable:$true] %s263_s12 }
  0x31   :  { %321 = vmatpush3.msra.mxu0 %v75_v8  ;;  %356 = vmatpush3.msra.mxu1 %v91_v11  ;;  %p456_p2 = scmp.lt.s32.totalorder %s254_s10, %s254_s10  ;;  %p457_p3 = scmp.lt.s32.totalorder %s451_s13, %s451_s13 }
  0x32   :  { %322 = vmatprep.subr.mxu0 %v504_v0  ;;  %357 = vmatprep.subr.mxu1 %v504_v0 }
  0x33   :  { %323 = vmatpush3.msra.mxu0 %v74_v10  ;;  %358 = vmatpush3.msra.mxu1 %v90_v13  ;;  %p458_p4 = por %p457_p3, %p456_p2 }
  0x34   :  { %324 = vmatprep.subr.mxu0 %v504_v0  ;;  %359 = vmatprep.subr.mxu1 %v504_v0 }
  0x35   :  { %325 = vmatpush3.msra.mxu0 %v73_v12  ;;  %360 = vmatpush3.msra.mxu1 %v89_v15  ;;  %p459_p5 = pnand %p458_p4, %p452_p1 }
  0x36   :  { %326 = vmatprep.subr.mxu0 %v504_v0  ;;  %361 = vmatprep.subr.mxu1 %v504_v0 }
  0x37   :  { %327 = vmatpush3.msra.mxu0 %v72_v14  ;;  %362 = vmatpush3.msra.mxu1 %v88_v17 }
  0x38   :  { %328 = vmatprep.subr.mxu0 %v504_v0  ;;  %363 = vmatprep.subr.mxu1 %v504_v0 }
  0x39   :  { %329 = vmatpush3.msra.mxu0 %v71_v16  ;;  %364 = vmatpush3.msra.mxu1 %v87_v19 }
  0x3a   :  { %330 = vmatprep.subr.mxu0 %v504_v0  ;;  %365 = vmatprep.subr.mxu1 %v504_v0 }
  0x3b   :  { %331 = vmatpush3.msra.mxu0 %v70_v18  ;;  %366 = vmatpush3.msra.mxu1 %v86_v21 }
  0x3c   :  { %332 = vmatprep.subr.mxu0 %v504_v0  ;;  %367 = vmatprep.subr.mxu1 %v504_v0 }
  0x3d   :  { %333 = vmatpush3.msra.mxu0 %v69_v20  ;;  %368 = vmatpush3.msra.mxu1 %v85_v23 }
  0x3e   :  { %334 = vmatprep.subr.mxu0 %v504_v0  ;;  %369 = vmatprep.subr.mxu1 %v504_v0 }
  0x3f   :  { %335 = vmatpush3.msra.mxu0 %v68_v22  ;;  %370 = vmatpush3.msra.mxu1 %v84_v25 }
  0x40   :  { %336 = vmatprep.subr.mxu0 %v504_v0  ;;  %371 = vmatprep.subr.mxu1 %v504_v0 }
  0x41   :  { %337 = vmatpush3.msra.mxu0 %v67_v24  ;;  %372 = vmatpush3.msra.mxu1 %v83_v29 }
  0x42   :  { %338 = vmatprep.subr.mxu0 %v504_v0  ;;  %373 = vmatprep.subr.mxu1 %v504_v0 }
  0x43   :  { %339 = vmatpush3.msra.mxu0 %v66_v28  ;;  %374 = vmatpush3.msra.mxu1 %v82_v32 }
  0x44   :  { %340 = vmatprep.subr.mxu0 %v504_v0  ;;  %375 = vmatprep.subr.mxu1 %v504_v0 }
  0x45   :  { %341 = vmatpush3.msra.mxu0 %v65_v30  ;;  %376 = vmatpush3.msra.mxu1 %v81_v35 }
  0x46   :  { %342 = vmatprep.subr.mxu0 %v504_v0  ;;  %377 = vmatprep.subr.mxu1 %v504_v0 }
  0x47   :  { %343 = vmatpush3.msra.mxu0 %v64_v33  ;;  %378 = vmatpush3.msra.mxu1 %v80_v37 }
  0x48   :  { %345 = vmatmul.mubr.f32.vlgmr.msra.gmra.mxu0 %v61_v36  ;;  %380 = vmatmul.mubr.f32.vlgmr.msra.gmra.mxu1 %v63_v38 }
 0x108   :  { %v169_v40 = vpop.f32.mrf.mxu0  ;;  %v239_v43 = vpop.f32.mrf.mxu1 }
 0x109   :  { %v170_v41 = vadd.f32 %v277_v39, %v169_v40 }
 0x10a   :  { %v346_v42 = vpop.f32.mrf.mxu0  ;;  %v381_v46 = vpop.f32.mrf.mxu1 }
 0x10b   :  { %v243_v44 = vsub.f32 %v170_v41, %v239_v43  ;;  %v245_v45 = vadd.f32 %v239_v43, %v170_v41 }
 0x10d   :  { %244 = vst [vmem:[#allocation8] sm:$0xff] %v243_v44  ;;  %246 = vst [vmem:[#allocation9] sm:$0xff] %v245_v45 }
 0x10e   :  { %462 = shalt.err (!%p459_p5)
}
 0x10f   :  { %256 = dma.vmem_to_hbm [thread:$0]  %s254_s10, 128, %s594_s4, [#allocation4]  }
 0x110   :  { %s471_s15 = scalar_lea.vmem %s264_s12, 128  ;;  %p476_p7 = scmp.lt.s32.totalorder %s264_s12, %s264_s12 }
 0x111   :  { %p472_p6 = scmp.ne.s32.totalorder %s264_s12, %s471_s15  ;;  %p477_p8 = scmp.lt.s32.totalorder %s471_s15, %s471_s15 }
 0x113   :  { %p478_p9 = por %p477_p8, %p476_p7 }
 0x115   :  { %p479_p10 = pnand %p478_p9, %p472_p6 }
 0x117   :  { %482 = shalt.err (!%p479_p10)
}
 0x118   :  { %266 = dma.vmem_to_hbm [thread:$0]  %s264_s12, 128, %s595_s5, [#allocation10]  }
 0x119   :  { %495 = dma.done.wait [#allocation4], 128  }
 0x11a   :  { %496 = vsyncadd [#allocation4], 4294967168 }
 0x11b   :  { %497 = dma.done.wait [#allocation10], 128  }
 0x11c   :  { %498 = vsyncadd [#allocation10], 4294967168 }
 0x11d   :  { %273 = vsyncpa [#allocation3], 1 }
 0x11e   :  { %274 = vsyncpa [#allocation6], 1 }
 0x11f   :  { %275 = vsyncpa [#allocation4], 1 }
 0x120   :  { %276 = vsyncpa [#allocation10], 1 }

</bundles_post_ra>
